<compile_context>
chip_gen: v6e
topology: v6e:2x2x1
jax: 0.10.0
libtpu: 0.0.40
codegen_flags: <defaults>
</compile_context>

<pallas_src>
import math

import jax
import jax.numpy as jnp
from jax.experimental import pallas as pl
from jax.experimental.pallas import tpu as pltpu

_DIMS = (300, 600, 150, 40, 10, 1)


def _round_up(n, m):
    return ((n + m - 1) // m) * m


def _mlp_kernel(alpha_ref,
                x_ref,
                w1_ref, b1_ref,
                w2_ref, b2_ref,
                w3_ref, b3_ref,
                w4_ref, b4_ref,
                w5_ref, b5_ref,
                o_ref):
    """Whole MLP for one batch tile. Weights are grid-invariant VMEM residents."""
    alpha = alpha_ref[0]                       # PReLU slope (f32 scalar in SMEM)

    def layer(h, w_ref, b_ref, activate):
        # bf16 x bf16 -> f32 accumulation on the MXU.
        acc = jnp.dot(h, w_ref[...], preferred_element_type=jnp.float32)
        acc = acc + b_ref[...]
        if activate:
            acc = jnp.where(acc > 0, acc, alpha * acc)   # PReLU in f32
            acc = acc.astype(jnp.bfloat16)               # bf16 operand for next MXU pass
        return acc

    h = x_ref[...]                             # (tile, 300) bf16
    h = layer(h, w1_ref, b1_ref, True)         # (tile, 640)
    h = layer(h, w2_ref, b2_ref, True)         # (tile, 256)
    h = layer(h, w3_ref, b3_ref, True)         # (tile, 128)
    h = layer(h, w4_ref, b4_ref, True)         # (tile, 128)
    h = layer(h, w5_ref, b5_ref, False)        # (tile, 128) f32; only column 0 is real
    o_ref[...] = (jnp.tanh(h[:, :1]) * 100.0).astype(o_ref.dtype)


def _pick_batch_tile(batch):
    # 512 rows feeds the 128/256-wide MXU with full passes, amortizes the
    # ~0.35us per-grid-step overhead, and fits the default scoped VMEM on
    # v5e/v6e/v7x with bf16 operands (weights ~0.8 MB, x tile ~0.3 MB).
    if batch >= 512:
        return 512
    return _round_up(batch, 8)


def net_forward(x, params, preluw, *, batch_tile=None, vmem_limit_bytes=None):
    """x: (B, 300). params: [(w_i, b_i)] in torch layout (out, in). Returns (B, 1) f32."""
    batch = x.shape[0]
    assert x.shape[1] == _DIMS[0]
    if batch_tile is None:
        batch_tile = _pick_batch_tile(batch)
    batch_tile = max(8, _round_up(min(batch_tile, _round_up(batch, 8)), 8))
    num_tiles = pl.cdiv(batch, batch_tile)

    # bf16 activations/weights for the MXU; no padded HBM copy of x.
    x_bf16 = x.astype(jnp.bfloat16)

    # Weights transposed to (in, out); out dims zero-padded to multiples of 128
    # (exact: padded lanes stay 0 through bias add and PReLU).  First in-dim
    # stays 300 == full array dim of x, so x needs no feature padding.
    pouts = [_round_up(d, 128) for d in _DIMS[1:]]    # [640, 256, 128, 128, 128]
    pins = [_DIMS[0]] + pouts[:-1]                    # [300, 640, 256, 128, 128]

    flat_params = []
    for i, (w, b) in enumerate(params):
        dout, din = w.shape
        pin, pout = pins[i], pouts[i]
        wp = jnp.zeros((pin, pout), jnp.bfloat16)
        wp = wp.at[:din, :dout].set(w.T.astype(jnp.bfloat16))
        bp = jnp.zeros((1, pout), jnp.float32).at[0, :dout].set(b.astype(jnp.float32))
        flat_params += [wp, bp]

    alpha = jnp.asarray(preluw, jnp.float32).reshape((1,))

    # x is tiled over the batch; weights/biases use constant index maps so the
    # pipeline fetches them once and keeps them resident in VMEM.
    in_specs = [pl.BlockSpec((batch_tile, _DIMS[0]), lambda i, a: (i, 0))]
    for p in flat_params:
        in_specs.append(pl.BlockSpec(p.shape, lambda i, a: (0, 0)))
    out_spec = pl.BlockSpec((batch_tile, 1), lambda i, a: (i, 0))

    flops = 2 * batch * sum(pi * po for pi, po in zip(pins, pouts))
    bytes_accessed = (int(x_bf16.size) * 2 + batch * 4
                      + sum(int(p.size) * p.dtype.itemsize for p in flat_params))
    cost = pl.CostEstimate(flops=flops, transcendentals=batch,
                           bytes_accessed=bytes_accessed)

    out = pl.pallas_call(
        _mlp_kernel,
        out_shape=jax.ShapeDtypeStruct((batch, 1), jnp.float32),
        grid_spec=pltpu.PrefetchScalarGridSpec(
            num_scalar_prefetch=1,          # alpha -> SMEM
            grid=(num_tiles,),
            in_specs=in_specs,
            out_specs=out_spec,
        ),
        compiler_params=pltpu.CompilerParams(
            dimension_semantics=("parallel",),
            vmem_limit_bytes=vmem_limit_bytes),
        cost_estimate=cost,
    )(alpha, x_bf16, *flat_params)

    return out


def init_params(key):
    """Mimics nn.Linear default init: U(-1/sqrt(fan_in), 1/sqrt(fan_in))."""
    params = []
    for i in range(5):
        din, dout = _DIMS[i], _DIMS[i + 1]
        key, kw, kb = jax.random.split(key, 3)
        bound = 1.0 / math.sqrt(din)
        w = jax.random.uniform(kw, (dout, din), jnp.float32, -bound, bound)
        b = jax.random.uniform(kb, (dout,), jnp.float32, -bound, bound)
        params.append((w, b))
    return params


def reference_forward(x, params, preluw, compute_dtype=jnp.float32):
    """Pure-JAX reference. compute_dtype=bfloat16 mirrors the kernel numerics."""
    def prelu(h):
        return jnp.where(h > 0, h, preluw * h)
    h = x.astype(compute_dtype)
    for i, (w, b) in enumerate(params):
        h = jnp.dot(h, w.T.astype(compute_dtype),
                    preferred_element_type=jnp.float32) + b
        if i < 4:
            h = prelu(h).astype(compute_dtype)
    return jnp.tanh(h) * 100.0


if __name__ == "__main__":
    key = jax.random.PRNGKey(0)
    kx, kp = jax.random.split(key)

    B = 8
    x = jax.random.normal(kx, (B, _DIMS[0]), jnp.float32)
    params = init_params(kp)
    preluw = 0.25

    out = jax.block_until_ready(net_forward(x, params, preluw))
    assert out.shape == (B, 1), out.shape

    # Same-precision reference (bf16 operands, f32 accumulation): tight check.
    ref_bf16 = reference_forward(x, params, preluw, compute_dtype=jnp.bfloat16)
    err_bf16 = float(jnp.max(jnp.abs(out - ref_bf16)))
    assert jnp.allclose(out, ref_bf16, atol=1e-1, rtol=1e-2), err_bf16

    # Full-f32 reference: loose sanity check (bounds bf16 operand rounding).
    ref_f32 = reference_forward(x, params, preluw, compute_dtype=jnp.float32)
    err_f32 = float(jnp.max(jnp.abs(out - ref_f32)))
    assert jnp.allclose(out, ref_f32, atol=5.0, rtol=1e-1), err_f32

    print("KERNEL_OK")
</pallas_src>

<mosaic_0001>
module attributes {stable_mosaic.version = 11 : i64} {
  func.func @_mlp_kernel(%arg0: i32, %arg1: memref<1xf32, #tpu.memory_space<smem>>, %arg2: memref<8x300xbf16, #tpu.memory_space<vmem>>, %arg3: memref<300x640xbf16, #tpu.memory_space<vmem>>, %arg4: memref<1x640xf32, #tpu.memory_space<vmem>>, %arg5: memref<640x256xbf16, #tpu.memory_space<vmem>>, %arg6: memref<1x256xf32, #tpu.memory_space<vmem>>, %arg7: memref<256x128xbf16, #tpu.memory_space<vmem>>, %arg8: memref<1x128xf32, #tpu.memory_space<vmem>>, %arg9: memref<128x128xbf16, #tpu.memory_space<vmem>>, %arg10: memref<1x128xf32, #tpu.memory_space<vmem>>, %arg11: memref<128x128xbf16, #tpu.memory_space<vmem>>, %arg12: memref<1x128xf32, #tpu.memory_space<vmem>>, %arg13: memref<8x1xf32, #tpu.memory_space<vmem>>) attributes {dimension_semantics = [#tpu.dimension_semantics<parallel>], iteration_bounds = array<i64: 1>, scalar_prefetch = 1 : i64, scratch_operands = 0 : i64, tpu.core_type = #tpu.core_type<tc>, window_params = [{transform_indices = @transform_0, window_bounds = array<i64: 8, 300>}, {pipeline_mode = #tpu.pipeline_mode<synchronous>, transform_indices = @transform_1, window_bounds = array<i64: 300, 640>}, {pipeline_mode = #tpu.pipeline_mode<synchronous>, transform_indices = @transform_2, window_bounds = array<i64: 1, 640>}, {pipeline_mode = #tpu.pipeline_mode<synchronous>, transform_indices = @transform_3, window_bounds = array<i64: 640, 256>}, {pipeline_mode = #tpu.pipeline_mode<synchronous>, transform_indices = @transform_4, window_bounds = array<i64: 1, 256>}, {pipeline_mode = #tpu.pipeline_mode<synchronous>, transform_indices = @transform_5, window_bounds = array<i64: 256, 128>}, {pipeline_mode = #tpu.pipeline_mode<synchronous>, transform_indices = @transform_6, window_bounds = array<i64: 1, 128>}, {pipeline_mode = #tpu.pipeline_mode<synchronous>, transform_indices = @transform_7, window_bounds = array<i64: 128, 128>}, {pipeline_mode = #tpu.pipeline_mode<synchronous>, transform_indices = @transform_8, window_bounds = array<i64: 1, 128>}, {pipeline_mode = #tpu.pipeline_mode<synchronous>, transform_indices = @transform_9, window_bounds = array<i64: 128, 128>}, {pipeline_mode = #tpu.pipeline_mode<synchronous>, transform_indices = @transform_10, window_bounds = array<i64: 1, 128>}, {transform_indices = @transform_11, window_bounds = array<i64: 8, 1>}]} {
    %c0 = arith.constant 0 : index
    %0 = memref.load %arg1[%c0] : memref<1xf32, #tpu.memory_space<smem>>
    %c0_0 = arith.constant 0 : index
    %c0_1 = arith.constant 0 : index
    %1 = vector.load %arg2[%c0_0, %c0_1] : memref<8x300xbf16, #tpu.memory_space<vmem>>, vector<8x300xbf16>
    %c0_2 = arith.constant 0 : index
    %c0_3 = arith.constant 0 : index
    %2 = vector.load %arg3[%c0_2, %c0_3] : memref<300x640xbf16, #tpu.memory_space<vmem>>, vector<300x640xbf16>
    %cst = arith.constant dense<0.000000e+00> : vector<8x640xf32>
    %3 = tpu.matmul %1, %2, %cst {dimension_numbers = #tpu.dot_dimension_numbers<[1], [0], [0], [1], [0, 0, 1, 1], [], []>} : vector<8x300xbf16>, vector<300x640xbf16>, vector<8x640xf32> -> vector<8x640xf32>
    %c0_4 = arith.constant 0 : index
    %c0_5 = arith.constant 0 : index
    %4 = vector.load %arg4[%c0_4, %c0_5] : memref<1x640xf32, #tpu.memory_space<vmem>>, vector<1x640xf32>
    %5 = vector.broadcast %4 : vector<1x640xf32> to vector<8x640xf32>
    %6 = arith.addf %3, %5 : vector<8x640xf32>
    %cst_6 = arith.constant 0.000000e+00 : f32
    %7 = vector.broadcast %cst_6 : f32 to vector<8x640xf32>
    %8 = arith.cmpf ogt, %6, %7 : vector<8x640xf32>
    %9 = vector.broadcast %0 : f32 to vector<8x640xf32>
    %10 = arith.mulf %9, %6 : vector<8x640xf32>
    %11 = arith.select %8, %6, %10 : vector<8x640xi1>, vector<8x640xf32>
    %12 = arith.truncf %11 : vector<8x640xf32> to vector<8x640xbf16>
    %c0_7 = arith.constant 0 : index
    %c0_8 = arith.constant 0 : index
    %13 = vector.load %arg5[%c0_7, %c0_8] : memref<640x256xbf16, #tpu.memory_space<vmem>>, vector<640x256xbf16>
    %cst_9 = arith.constant dense<0.000000e+00> : vector<8x256xf32>
    %14 = tpu.matmul %12, %13, %cst_9 {dimension_numbers = #tpu.dot_dimension_numbers<[1], [0], [0], [1], [0, 0, 1, 1], [], []>} : vector<8x640xbf16>, vector<640x256xbf16>, vector<8x256xf32> -> vector<8x256xf32>
    %c0_10 = arith.constant 0 : index
    %c0_11 = arith.constant 0 : index
    %15 = vector.load %arg6[%c0_10, %c0_11] : memref<1x256xf32, #tpu.memory_space<vmem>>, vector<1x256xf32>
    %16 = vector.broadcast %15 : vector<1x256xf32> to vector<8x256xf32>
    %17 = arith.addf %14, %16 : vector<8x256xf32>
    %cst_12 = arith.constant 0.000000e+00 : f32
    %18 = vector.broadcast %cst_12 : f32 to vector<8x256xf32>
    %19 = arith.cmpf ogt, %17, %18 : vector<8x256xf32>
    %20 = vector.broadcast %0 : f32 to vector<8x256xf32>
    %21 = arith.mulf %20, %17 : vector<8x256xf32>
    %22 = arith.select %19, %17, %21 : vector<8x256xi1>, vector<8x256xf32>
    %23 = arith.truncf %22 : vector<8x256xf32> to vector<8x256xbf16>
    %c0_13 = arith.constant 0 : index
    %c0_14 = arith.constant 0 : index
    %24 = vector.load %arg7[%c0_13, %c0_14] : memref<256x128xbf16, #tpu.memory_space<vmem>>, vector<256x128xbf16>
    %cst_15 = arith.constant dense<0.000000e+00> : vector<8x128xf32>
    %25 = tpu.matmul %23, %24, %cst_15 {dimension_numbers = #tpu.dot_dimension_numbers<[1], [0], [0], [1], [0, 0, 1, 1], [], []>} : vector<8x256xbf16>, vector<256x128xbf16>, vector<8x128xf32> -> vector<8x128xf32>
    %c0_16 = arith.constant 0 : index
    %c0_17 = arith.constant 0 : index
    %26 = vector.load %arg8[%c0_16, %c0_17] : memref<1x128xf32, #tpu.memory_space<vmem>>, vector<1x128xf32>
    %27 = vector.broadcast %26 : vector<1x128xf32> to vector<8x128xf32>
    %28 = arith.addf %25, %27 : vector<8x128xf32>
    %cst_18 = arith.constant 0.000000e+00 : f32
    %29 = vector.broadcast %cst_18 : f32 to vector<8x128xf32>
    %30 = arith.cmpf ogt, %28, %29 : vector<8x128xf32>
    %31 = vector.broadcast %0 : f32 to vector<8x128xf32>
    %32 = arith.mulf %31, %28 : vector<8x128xf32>
    %33 = arith.select %30, %28, %32 : vector<8x128xi1>, vector<8x128xf32>
    %34 = arith.truncf %33 : vector<8x128xf32> to vector<8x128xbf16>
    %c0_19 = arith.constant 0 : index
    %c0_20 = arith.constant 0 : index
    %35 = vector.load %arg9[%c0_19, %c0_20] : memref<128x128xbf16, #tpu.memory_space<vmem>>, vector<128x128xbf16>
    %cst_21 = arith.constant dense<0.000000e+00> : vector<8x128xf32>
    %36 = tpu.matmul %34, %35, %cst_21 {dimension_numbers = #tpu.dot_dimension_numbers<[1], [0], [0], [1], [0, 0, 1, 1], [], []>} : vector<8x128xbf16>, vector<128x128xbf16>, vector<8x128xf32> -> vector<8x128xf32>
    %c0_22 = arith.constant 0 : index
    %c0_23 = arith.constant 0 : index
    %37 = vector.load %arg10[%c0_22, %c0_23] : memref<1x128xf32, #tpu.memory_space<vmem>>, vector<1x128xf32>
    %38 = vector.broadcast %37 : vector<1x128xf32> to vector<8x128xf32>
    %39 = arith.addf %36, %38 : vector<8x128xf32>
    %cst_24 = arith.constant 0.000000e+00 : f32
    %40 = vector.broadcast %cst_24 : f32 to vector<8x128xf32>
    %41 = arith.cmpf ogt, %39, %40 : vector<8x128xf32>
    %42 = vector.broadcast %0 : f32 to vector<8x128xf32>
    %43 = arith.mulf %42, %39 : vector<8x128xf32>
    %44 = arith.select %41, %39, %43 : vector<8x128xi1>, vector<8x128xf32>
    %45 = arith.truncf %44 : vector<8x128xf32> to vector<8x128xbf16>
    %c0_25 = arith.constant 0 : index
    %c0_26 = arith.constant 0 : index
    %46 = vector.load %arg11[%c0_25, %c0_26] : memref<128x128xbf16, #tpu.memory_space<vmem>>, vector<128x128xbf16>
    %cst_27 = arith.constant dense<0.000000e+00> : vector<8x128xf32>
    %47 = tpu.matmul %45, %46, %cst_27 {dimension_numbers = #tpu.dot_dimension_numbers<[1], [0], [0], [1], [0, 0, 1, 1], [], []>} : vector<8x128xbf16>, vector<128x128xbf16>, vector<8x128xf32> -> vector<8x128xf32>
    %c0_28 = arith.constant 0 : index
    %c0_29 = arith.constant 0 : index
    %48 = vector.load %arg12[%c0_28, %c0_29] : memref<1x128xf32, #tpu.memory_space<vmem>>, vector<1x128xf32>
    %49 = vector.broadcast %48 : vector<1x128xf32> to vector<8x128xf32>
    %50 = arith.addf %47, %49 : vector<8x128xf32>
    %51 = vector.extract_strided_slice %50 {offsets = [0, 0], sizes = [8, 1], strides = [1, 1]} : vector<8x128xf32> to vector<8x1xf32>
    %52 = math.tanh %51 : vector<8x1xf32>
    %cst_30 = arith.constant 1.000000e+02 : f32
    %53 = vector.broadcast %cst_30 : f32 to vector<8x1xf32>
    %54 = arith.mulf %52, %53 : vector<8x1xf32>
    %c0_31 = arith.constant 0 : index
    %c0_32 = arith.constant 0 : index
    %55 = vector.load %arg13[%c0_31, %c0_32] : memref<8x1xf32, #tpu.memory_space<vmem>>, vector<8x1xf32>
    tpu.vector_store %arg13[%c0_31, %c0_32], %54 {strides = array<i32>} : memref<8x1xf32, #tpu.memory_space<vmem>>, vector<8x1xf32>,
    return
  }
  func.func @transform_0(%arg0: i32, %arg1: memref<1xf32, #tpu.memory_space<smem>>) -> (i32, i32) {
    %c0_i32 = arith.constant 0 : i32
    %c0_i32_0 = arith.constant 0 : i32
    return %arg0, %c0_i32 : i32, i32
  }
  func.func @transform_1(%arg0: i32, %arg1: memref<1xf32, #tpu.memory_space<smem>>) -> (i32, i32) {
    %c0_i32 = arith.constant 0 : i32
    %c0_i32_0 = arith.constant 0 : i32
    %c0_i32_1 = arith.constant 0 : i32
    return %c0_i32, %c0_i32_0 : i32, i32
  }
  func.func @transform_2(%arg0: i32, %arg1: memref<1xf32, #tpu.memory_space<smem>>) -> (i32, i32) {
    %c0_i32 = arith.constant 0 : i32
    %c0_i32_0 = arith.constant 0 : i32
    %c0_i32_1 = arith.constant 0 : i32
    return %c0_i32, %c0_i32_0 : i32, i32
  }
  func.func @transform_3(%arg0: i32, %arg1: memref<1xf32, #tpu.memory_space<smem>>) -> (i32, i32) {
    %c0_i32 = arith.constant 0 : i32
    %c0_i32_0 = arith.constant 0 : i32
    %c0_i32_1 = arith.constant 0 : i32
    return %c0_i32, %c0_i32_0 : i32, i32
  }
  func.func @transform_4(%arg0: i32, %arg1: memref<1xf32, #tpu.memory_space<smem>>) -> (i32, i32) {
    %c0_i32 = arith.constant 0 : i32
    %c0_i32_0 = arith.constant 0 : i32
    %c0_i32_1 = arith.constant 0 : i32
    return %c0_i32, %c0_i32_0 : i32, i32
  }
  func.func @transform_5(%arg0: i32, %arg1: memref<1xf32, #tpu.memory_space<smem>>) -> (i32, i32) {
    %c0_i32 = arith.constant 0 : i32
    %c0_i32_0 = arith.constant 0 : i32
    %c0_i32_1 = arith.constant 0 : i32
    return %c0_i32, %c0_i32_0 : i32, i32
  }
  func.func @transform_6(%arg0: i32, %arg1: memref<1xf32, #tpu.memory_space<smem>>) -> (i32, i32) {
    %c0_i32 = arith.constant 0 : i32
    %c0_i32_0 = arith.constant 0 : i32
    %c0_i32_1 = arith.constant 0 : i32
    return %c0_i32, %c0_i32_0 : i32, i32
  }
  func.func @transform_7(%arg0: i32, %arg1: memref<1xf32, #tpu.memory_space<smem>>) -> (i32, i32) {
    %c0_i32 = arith.constant 0 : i32
    %c0_i32_0 = arith.constant 0 : i32
    %c0_i32_1 = arith.constant 0 : i32
    return %c0_i32, %c0_i32_0 : i32, i32
  }
  func.func @transform_8(%arg0: i32, %arg1: memref<1xf32, #tpu.memory_space<smem>>) -> (i32, i32) {
    %c0_i32 = arith.constant 0 : i32
    %c0_i32_0 = arith.constant 0 : i32
    %c0_i32_1 = arith.constant 0 : i32
    return %c0_i32, %c0_i32_0 : i32, i32
  }
  func.func @transform_9(%arg0: i32, %arg1: memref<1xf32, #tpu.memory_space<smem>>) -> (i32, i32) {
    %c0_i32 = arith.constant 0 : i32
    %c0_i32_0 = arith.constant 0 : i32
    %c0_i32_1 = arith.constant 0 : i32
    return %c0_i32, %c0_i32_0 : i32, i32
  }
  func.func @transform_10(%arg0: i32, %arg1: memref<1xf32, #tpu.memory_space<smem>>) -> (i32, i32) {
    %c0_i32 = arith.constant 0 : i32
    %c0_i32_0 = arith.constant 0 : i32
    %c0_i32_1 = arith.constant 0 : i32
    return %c0_i32, %c0_i32_0 : i32, i32
  }
  func.func @transform_11(%arg0: i32, %arg1: memref<1xf32, #tpu.memory_space<smem>>) -> (i32, i32) {
    %c0_i32 = arith.constant 0 : i32
    %c0_i32_0 = arith.constant 0 : i32
    return %arg0, %c0_i32 : i32, i32
  }
}

</mosaic_0001>

<bundles_post_ra>
// kernel: tpu_custom_call.1
= control target key start
LH: loop header
LB: loop body
LE: loop exit
PB: predicated region body
PF: predicated region fallthrough
CT: control target
= control target key end

     0   :  { %18 = vsyncpa [#allocation5], 0  ;;  %s3063_s0 = inlined_call_operand.<no memory space> [shape: f32[1], index: 0, kind: input, shape index: {}]   ;;  %s3064_s1 = inlined_call_operand.hbm [shape: bf16[8,300], index: 1, kind: input, shape index: {}]   ;;  %s3065_s2 = inlined_call_operand.hbm [shape: bf16[300,640], index: 2, kind: input, shape index: {}]   ;;  %s3066_s3 = inlined_call_operand.vmem [shape: f32[1,640], index: 3, kind: input, shape index: {}]   ;;  %s3067_s4 = inlined_call_operand.hbm [shape: bf16[640,256], index: 4, kind: input, shape index: {}]   ;;  %s3068_s5 = inlined_call_operand.vmem [shape: f32[1,256], index: 5, kind: input, shape index: {}]   ;;  %s3069_s6 = inlined_call_operand.hbm [shape: bf16[256,128], index: 6, kind: input, shape index: {}]   ;;  %s3070_s7 = inlined_call_operand.vmem [shape: f32[1,128], index: 7, kind: input, shape index: {}]   ;;  %s3071_s8 = inlined_call_operand.hbm [shape: bf16[128,128], index: 8, kind: input, shape index: {}]   ;;  %s3072_s9 = inlined_call_operand.vmem [shape: f32[1,128], index: 9, kind: input, shape index: {}]   ;;  %s3073_s10 = inlined_call_operand.hbm [shape: bf16[128,128], index: 10, kind: input, shape index: {}]   ;;  %s3074_s11 = inlined_call_operand.vmem [shape: f32[1,128], index: 11, kind: input, shape index: {}]   ;;  %s3075_s12 = inlined_call_operand.vmem [shape: f32[8,1], index: 12, kind: output, shape index: {}]  }
   0x1   :  { %19 = vsyncpa [#allocation7], 0 }
   0x2   :  { %20 = vsyncpa [#allocation10], 0 }
   0x3   :  { %21 = vsyncpa [#allocation13], 0  ;;  %s2856_s21 = smov [#allocation6]  }
   0x4   :  { %s37_s22 = sshll.u32 %s2856_s21, 4  ;;  %s38_s22 = int_to_ptr.vmem [resolvable:$true] %s37_s22 }
   0x5   :  { %s2736_s23 = scalar_lea.vmem %s38_s22, 12160  ;;  %p2741_p1 = scmp.lt.s32.totalorder %s38_s22, %s38_s22 }
   0x6   :  { %p2737_p0 = scmp.ne.s32.totalorder %s38_s22, %s2736_s23  ;;  %p2742_p2 = scmp.lt.s32.totalorder %s2736_s23, %s2736_s23 }
   0x8   :  { %p2743_p3 = por %p2742_p2, %p2741_p1 }
   0xa   :  { %p2744_p4 = pnand %p2743_p3, %p2737_p0 }
   0xc   :  { %2747 = shalt.err (!%p2744_p4)
}
   0xd   :  { %s2857_s24 = smov 320   ;;  %s2858_s25 = smov 20  }
   0xe   :  { %43 = dma.hbm_to_vmem [thread:$0]  %s3065_s2, 12160, %s38_s22, [#allocation7], %s2857_s24, %s2857_s24, %s2858_s25  }
   0xf   :  { %s2859_s28 = smov [#allocation9]  }
  0x10   :  { %s65_s29 = sshll.u32 %s2859_s28, 4  ;;  %s66_s29 = int_to_ptr.vmem [resolvable:$true] %s65_s29 }
  0x11   :  { %s2756_s30 = scalar_lea.vmem %s66_s29, 2048  ;;  %p2761_p6 = scmp.lt.s32.totalorder %s66_s29, %s66_s29 }
  0x12   :  { %p2757_p5 = scmp.ne.s32.totalorder %s66_s29, %s2756_s30  ;;  %p2762_p7 = scmp.lt.s32.totalorder %s2756_s30, %s2756_s30 }
  0x14   :  { %p2763_p8 = por %p2762_p7, %p2761_p6 }
  0x16   :  { %p2764_p9 = pnand %p2763_p8, %p2757_p5 }
  0x18   :  { %2767 = shalt.err (!%p2764_p9)
}
  0x19   :  { %s2860_s13 = smov 64   ;;  %s2861_s14 = smov 4  }
  0x1a   :  { %71 = dma.hbm_to_vmem [thread:$0]  %s3069_s6, 2048, %s66_s29, [#allocation10], %s2860_s13, %s2860_s13, %s2861_s14  }
  0x1b   :  { %s2862_s2 = smov [#allocation4]   ;;  %s2863_s18 = smov [#allocation8]  }
  0x1c   :  { %s28_s17 = sshll.u32 %s2862_s2, 4  ;;  %s51_s19 = sshll.u32 %s2863_s18, 4  ;;  %s29_s17 = int_to_ptr.vmem [resolvable:$true] %s28_s17  ;;  %s52_s19 = int_to_ptr.vmem [resolvable:$true] %s51_s19 }
  0x1d   :  { %s2776_s20 = scalar_lea.vmem %s29_s17, 192  ;;  %p2781_p11 = scmp.lt.s32.totalorder %s29_s17, %s29_s17 }
  0x1e   :  { %p2777_p10 = scmp.ne.s32.totalorder %s29_s17, %s2776_s20  ;;  %p2782_p12 = scmp.lt.s32.totalorder %s2776_s20, %s2776_s20 }
  0x20   :  { %p2783_p13 = por %p2782_p12, %p2781_p11 }
  0x22   :  { %p2784_p0 = pnand %p2783_p13, %p2777_p10 }
  0x24   :  { %2787 = shalt.err (!%p2784_p0)
}
  0x25   :  { %31 = dma.hbm_to_vmem [thread:$0]  %s3064_s1, 192, %s29_s17, [#allocation5]  }
  0x26   :  { %s2796_s23 = scalar_lea.vmem %s52_s19, 10240  ;;  %p2801_p2 = scmp.lt.s32.totalorder %s52_s19, %s52_s19 }
  0x27   :  { %p2797_p1 = scmp.ne.s32.totalorder %s52_s19, %s2796_s23  ;;  %p2802_p3 = scmp.lt.s32.totalorder %s2796_s23, %s2796_s23 }
  0x29   :  { %p2803_p4 = por %p2802_p3, %p2801_p2 }
  0x2b   :  { %p2804_p5 = pnand %p2803_p4, %p2797_p1 }
  0x2d   :  { %2807 = shalt.err (!%p2804_p5)
}
  0x2e   :  { %s2864_s6 = smov 128   ;;  %s2865_s24 = smov 8  }
  0x2f   :  { %57 = dma.hbm_to_vmem [thread:$0]  %s3067_s4, 10240, %s52_s19, [#allocation7], %s2864_s6, %s2864_s6, %s2865_s24  }
  0x30   :  { %s2866_s27 = smov [#allocation11]   ;;  %s2867_s29 = smov [#allocation12]  }
  0x31   :  { %s79_s28 = sshll.u32 %s2866_s27, 4  ;;  %s93_s30 = sshll.u32 %s2867_s29, 4  ;;  %s80_s28 = int_to_ptr.vmem [resolvable:$true] %s79_s28  ;;  %s94_s30 = int_to_ptr.vmem [resolvable:$true] %s93_s30 }
  0x32   :  { %s2816_s1 = scalar_lea.vmem %s80_s28, 1024  ;;  %p2821_p7 = scmp.lt.s32.totalorder %s80_s28, %s80_s28 }
  0x33   :  { %p2817_p6 = scmp.ne.s32.totalorder %s80_s28, %s2816_s1  ;;  %p2822_p8 = scmp.lt.s32.totalorder %s2816_s1, %s2816_s1 }
  0x35   :  { %p2823_p9 = por %p2822_p8, %p2821_p7 }
  0x37   :  { %p2824_p10 = pnand %p2823_p9, %p2817_p6 }
  0x39   :  { %2827 = shalt.err (!%p2824_p10)
}
  0x3a   :  { %85 = dma.hbm_to_vmem [thread:$0]  %s3071_s8, 1024, %s80_s28, [#allocation10], %s2860_s13, %s2860_s13, %s2861_s14  }
  0x3b   :  { %s2836_s4 = scalar_lea.vmem %s94_s30, 1024  ;;  %p2841_p12 = scmp.lt.s32.totalorder %s94_s30, %s94_s30 }
  0x3c   :  { %p2837_p11 = scmp.ne.s32.totalorder %s94_s30, %s2836_s4  ;;  %p2842_p13 = scmp.lt.s32.totalorder %s2836_s4, %s2836_s4 }
  0x3e   :  { %p2843_p0 = por %p2842_p13, %p2841_p12 }
  0x40   :  { %p2844_p1 = pnand %p2843_p0, %p2837_p11 }
  0x42   :  { %2847 = shalt.err (!%p2844_p1)
}
  0x43   :  { %99 = dma.hbm_to_vmem [thread:$0]  %s3073_s10, 1024, %s94_s30, [#allocation13], %s2860_s13, %s2860_s13, %s2861_s14  }
  0x44   :  { %2848 = dma.done.wait [#allocation5], 192  }
  0x45   :  { %2849 = vsyncadd [#allocation5], 4294967104 }
  0x46   :  { %2850 = dma.done.wait [#allocation7], 22400  }
  0x47   :  { %2851 = vsyncadd [#allocation7], 4294944896 }
  0x48   :  { %2852 = dma.done.wait [#allocation10], 3072  }
  0x49   :  { %2853 = vsyncadd [#allocation10], 4294964224 }
  0x4a   :  { %2854 = dma.done.wait [#allocation13], 1024  }
  0x4b   :  { %2855 = vsyncadd [#allocation13], 4294966272  ;;  %v2868_v0 = vmov 0   ;;  %v2438_v1 = vld [vmem:[#allocation6 + $0x11c] ss:$20 sps:$4 sm:$0xff]   ;;  %vm768_vm0 = vcmask 1045504  }
  0x4c   :  { %857 = vmatprep.mubr.bf16.mxu1 %v2868_v0  ;;  %v2440_v2 = vld [vmem:[#allocation6 + $0x2d4] ss:$20 sps:$4 sm:$0x3f]   ;;  %784 = vmatprep.subr.bf16.mxu0 %v2438_v1  ;;  %v2442_v3 = vld [vmem:[#allocation6 + $0x118] ss:$20 sps:$4 sm:$0xff]   ;;  %vm764_vm1 = vcmask 359424  }
  0x4d   :  { %v2443_v4 = vld [vmem:[#allocation6 + $0x2d0] ss:$20 sps:$4 sm:$0x3f]   ;;  %2187 = vmatprep.subr.msk.bf16.mxu1 %vm768_vm0, %v2440_v2  ;;  %v2444_v5 = vld [vmem:[#allocation6 + $0xf4] ss:$20 sps:$4 sm:$0xff]   ;;  %785 = vmatpush1.bf16.msra.mxu0 %v2442_v3  ;;  %vm2870_vm2 = vmmov 0  }
  0x4e   :  { %v770_v6 = vsel %vm768_vm0, %v2443_v4, 0  ;;  %v2446_v7 = vld [vmem:[#allocation6 + $0x2ac] ss:$20 sps:$4 sm:$0xff]   ;;  %v2448_v8 = vld [vmem:[#allocation6 + $0xf0] ss:$20 sps:$4 sm:$0xff]   ;;  %786 = vmatprep.subr.bf16.mxu0 %v2444_v5  ;;  %v122_v49 = vld [vmem:[#allocation4] sm:$0xff] }
  0x4f   :  { %836 = vmatpush1.bf16.msra.mxu1 %v770_v6  ;;  %v2449_v9 = vld [vmem:[#allocation6 + $0x2a8] ss:$20 sps:$4 sm:$0xff]   ;;  %v2450_v10 = vld [vmem:[#allocation6 + $0xcc] ss:$20 sps:$4 sm:$0xff]   ;;  %v2452_v11 = vld [vmem:[#allocation6 + $0x284] ss:$20 sps:$4 sm:$0xff]   ;;  %v2090_v52 = vcombine.high %v122_v49, %v122_v49 }
  0x50   :  { %837 = vmatprep.subr.bf16.mxu1 %v2446_v7  ;;  %v2454_v12 = vld [vmem:[#allocation6 + $0xc8] ss:$20 sps:$4 sm:$0xff]   ;;  %v2455_v13 = vld [vmem:[#allocation6 + $0x280] ss:$20 sps:$4 sm:$0xff]   ;;  %v2456_v14 = vld [vmem:[#allocation6 + $0xa4] ss:$20 sps:$4 sm:$0xff]  }
  0x51   :  { %787 = vmatpush1.bf16.msra.mxu0 %v2448_v8  ;;  %v2461_v15 = vld [vmem:[#allocation6 + $0x124] ss:$20 sps:$4 sm:$0xff]   ;;  %v2966_v16 = vld [vmem:[#allocation4 + $0x8] ss:$0 sps:$4 sm:$0xff]   ;;  %v2462_v17 = vld [vmem:[#allocation6 + $0xa0] ss:$20 sps:$4 sm:$0xff]   ;;  %816 = vmatprep.mubr.bf16.mxu0 %v2090_v52  ;;  %v2970_v8 = vcombine.low %v122_v49, %v122_v49 }
  0x52   :  { %788 = vmatprep.subr.bf16.mxu0 %v2450_v10  ;;  %v2459_v18 = vld [vmem:[#allocation6 + $0x120] ss:$20 sps:$4 sm:$0xff]   ;;  %v2463_v19 = vld [vmem:[#allocation6 + $0x7c] ss:$20 sps:$4 sm:$0xff]   ;;  %v2465_v21 = vld [vmem:[#allocation6 + $0xf8] ss:$20 sps:$4 sm:$0xff]  }
  0x53   :  { %838 = vmatpush1.bf16.msra.mxu1 %v2449_v9  ;;  %v2467_v20 = vld [vmem:[#allocation6 + $0xfc] ss:$20 sps:$4 sm:$0xff]   ;;  %v2468_v22 = vld [vmem:[#allocation6 + $0x78] ss:$20 sps:$4 sm:$0xff]   ;;  %v2469_v23 = vld [vmem:[#allocation6 + $0x54] ss:$20 sps:$4 sm:$0xff]  }
  0x54   :  { %839 = vmatprep.subr.bf16.mxu1 %v2452_v11  ;;  %v2473_v24 = vld [vmem:[#allocation6 + $0xd4] ss:$20 sps:$4 sm:$0xff]   ;;  %v2474_v25 = vld [vmem:[#allocation6 + $0x50] ss:$20 sps:$4 sm:$0xff]   ;;  %v2475_v27 = vld [vmem:[#allocation6 + $0x2c] ss:$20 sps:$4 sm:$0xff]  }
  0x55   :  { %789 = vmatpush1.bf16.msra.mxu0 %v2454_v12  ;;  %v2471_v26 = vld [vmem:[#allocation6 + $0xd0] ss:$20 sps:$4 sm:$0xff]   ;;  %v2479_v28 = vld [vmem:[#allocation6 + $0xac] ss:$20 sps:$4 sm:$0xff]   ;;  %v2477_v29 = vld [vmem:[#allocation6 + $0xa8] ss:$20 sps:$4 sm:$0xff]  }
  0x56   :  { %790 = vmatprep.subr.bf16.mxu0 %v2456_v14  ;;  %v2480_v30 = vld [vmem:[#allocation6 + $0x28] ss:$20 sps:$4 sm:$0xff]   ;;  %v2481_v31 = vld [vmem:[#allocation6 + $0x4] ss:$20 sps:$4 sm:$0xff]   ;;  %v2486_v33 = vld [vmem:[#allocation6] ss:$20 sps:$4 sm:$0xff]  }
  0x57   :  { %840 = vmatpush1.bf16.msra.mxu1 %v2455_v13  ;;  %v2485_v32 = vld [vmem:[#allocation6 + $0x84] ss:$20 sps:$4 sm:$0xff]   ;;  %v2483_v34 = vld [vmem:[#allocation6 + $0x80] ss:$20 sps:$4 sm:$0xff]   ;;  %v2487_v35 = vld [vmem:[#allocation6 + $0x25c] ss:$20 sps:$4 sm:$0xff]  }
  0x58   :  { %866 = vmatprep.subr.bf16.mxu1 %v2461_v15  ;;  %v2491_v36 = vld [vmem:[#allocation6 + $0x5c] ss:$20 sps:$4 sm:$0xff]   ;;  %v2489_v37 = vld [vmem:[#allocation6 + $0x58] ss:$20 sps:$4 sm:$0xff]   ;;  %v2493_v39 = vld [vmem:[#allocation6 + $0x234] ss:$20 sps:$4 sm:$0xff]  }
  0x59   :  { %791 = vmatpush1.bf16.msra.mxu0 %v2462_v17  ;;  %v2492_v38 = vld [vmem:[#allocation6 + $0x258] ss:$20 sps:$4 sm:$0xff]   ;;  %v2497_v40 = vld [vmem:[#allocation6 + $0x34] ss:$20 sps:$4 sm:$0xff]   ;;  %v2498_v41 = vld [vmem:[#allocation6 + $0x230] ss:$20 sps:$4 sm:$0xff]  }
  0x5a   :  { %2188 = vmatmul.mubr.msk.bf16.vlgmr.msra.gmra.mxu1 %vm764_vm1, %v2966_v16  ;;  %792 = vmatprep.subr.bf16.mxu0 %v2463_v19  ;;  %v2495_v42 = vld [vmem:[#allocation6 + $0x30] ss:$20 sps:$4 sm:$0xff]   ;;  %v2499_v43 = vld [vmem:[#allocation6 + $0x20c] ss:$20 sps:$4 sm:$0xff]   ;;  %v2501_v45 = vld [vmem:[#allocation6 + $0x8] ss:$20 sps:$4 sm:$0xff]  }
  0x5b   :  { %867 = vmatpush1.bf16.msra.mxu1 %v2459_v18  ;;  %v2503_v44 = vld [vmem:[#allocation6 + $0xc] ss:$20 sps:$4 sm:$0xff]   ;;  %v2504_v46 = vld [vmem:[#allocation6 + $0x208] ss:$20 sps:$4 sm:$0xff]   ;;  %v2505_v47 = vld [vmem:[#allocation6 + $0x1e4] ss:$20 sps:$4 sm:$0xff]   ;;  %898 = vmatprep.mubr.bf16.mxu1 %v2090_v52 }
  0x5c   :  { %868 = vmatprep.subr.bf16.mxu1 %v2467_v20  ;;  %v2509_v48 = vld [vmem:[#allocation6 + $0x264] ss:$20 sps:$4 sm:$0xff]   ;;  %v2507_v50 = vld [vmem:[#allocation6 + $0x260] ss:$20 sps:$4 sm:$0xff]   ;;  %v2511_v53 = vld [vmem:[#allocation6 + $0x1bc] ss:$20 sps:$4 sm:$0xff]  }
  0x5d   :  { %793 = vmatpush1.bf16.msra.mxu0 %v2468_v22  ;;  %v2510_v51 = vld [vmem:[#allocation6 + $0x1e0] ss:$20 sps:$4 sm:$0xff]   ;;  %v2515_v54 = vld [vmem:[#allocation6 + $0x23c] ss:$20 sps:$4 sm:$0xff]   ;;  %v2513_v55 = vld [vmem:[#allocation6 + $0x238] ss:$20 sps:$4 sm:$0xff]  }
  0x5e   :  { %794 = vmatprep.subr.bf16.mxu0 %v2469_v23  ;;  %v2516_v56 = vld [vmem:[#allocation6 + $0x1b8] ss:$20 sps:$4 sm:$0xff]   ;;  %v2517_v57 = vld [vmem:[#allocation6 + $0x194] ss:$20 sps:$4 sm:$0xff]   ;;  %v2519_v59 = vld [vmem:[#allocation6 + $0x210] ss:$20 sps:$4 sm:$0xff]  }
  0x5f   :  { %869 = vmatpush1.bf16.msra.mxu1 %v2465_v21  ;;  %v2521_v58 = vld [vmem:[#allocation6 + $0x214] ss:$20 sps:$4 sm:$0xff]   ;;  %v2522_v60 = vld [vmem:[#allocation6 + $0x190] ss:$20 sps:$4 sm:$0xff]   ;;  %v2523_v61 = vld [vmem:[#allocation6 + $0x16c] ss:$20 sps:$4 sm:$0xff]  }
  0x60   :  { %870 = vmatprep.subr.bf16.mxu1 %v2473_v24  ;;  %v2527_v62 = vld [vmem:[#allocation6 + $0x1ec] ss:$20 sps:$4 sm:$0xff]   ;;  %v2528_v63 = vld [vmem:[#allocation6 + $0x168] ss:$20 sps:$4 sm:$0xff]   ;;  %v2529_v2 = vld [vmem:[#allocation6 + $0x144] ss:$20 sps:$4 sm:$0xff]  }
  0x61   :  { %795 = vmatpush1.bf16.msra.mxu0 %v2474_v25  ;;  %v2525_v1 = vld [vmem:[#allocation6 + $0x1e8] ss:$20 sps:$4 sm:$0xff]   ;;  %v2533_v3 = vld [vmem:[#allocation6 + $0x1c4] ss:$20 sps:$4 sm:$0xff]   ;;  %v2534_v4 = vld [vmem:[#allocation6 + $0x140] ss:$20 sps:$4 sm:$0xff]  }
  0x62   :  { %796 = vmatprep.subr.bf16.mxu0 %v2475_v27  ;;  %v2531_v5 = vld [vmem:[#allocation6 + $0x1c0] ss:$20 sps:$4 sm:$0xff]   ;;  %v2540_v6 = vld [vmem:[#allocation6 + $0x268] ss:$20 sps:$4 sm:$0xff]   ;;  %v2537_v9 = vld [vmem:[#allocation6 + $0x198] ss:$20 sps:$4 sm:$0xff]  }
  0x63   :  { %871 = vmatpush1.bf16.msra.mxu1 %v2471_v26  ;;  %v2539_v7 = vld [vmem:[#allocation6 + $0x19c] ss:$20 sps:$4 sm:$0xff]   ;;  %v2545_v11 = vld [vmem:[#allocation6 + $0x240] ss:$20 sps:$4 sm:$0xff]   ;;  %v2550_v17 = vld [vmem:[#allocation6 + $0x218] ss:$20 sps:$4 sm:$0xff]  }
  0x64   :  { %872 = vmatprep.subr.bf16.mxu1 %v2479_v28  ;;  %v2541_v10 = vld [vmem:[#allocation6 + $0x128] ss:$20 sps:$4 sm:$0xff]   ;;  %v2542_v13 = vld [vmem:[#allocation6 + $0x170] ss:$20 sps:$4 sm:$0xff]   ;;  %v2546_v14 = vld [vmem:[#allocation6 + $0x100] ss:$20 sps:$4 sm:$0xff]  }
  0x65   :  { %797 = vmatpush1.bf16.msra.mxu0 %v2480_v30  ;;  %v2544_v12 = vld [vmem:[#allocation6 + $0x174] ss:$20 sps:$4 sm:$0xff]   ;;  %v2549_v15 = vld [vmem:[#allocation6 + $0x14c] ss:$20 sps:$4 sm:$0xff]   ;;  %v2554_v20 = vld [vmem:[#allocation6 + $0x1f0] ss:$20 sps:$4 sm:$0xff]  }
  0x66   :  { %798 = vmatprep.subr.bf16.mxu0 %v2481_v31  ;;  %v2551_v18 = vld [vmem:[#allocation6 + $0xd8] ss:$20 sps:$4 sm:$0xff]   ;;  %v2547_v19 = vld [vmem:[#allocation6 + $0x148] ss:$20 sps:$4 sm:$0xff]   ;;  %v2556_v23 = vld [vmem:[#allocation6 + $0xb0] ss:$20 sps:$4 sm:$0xff]  }
  0x67   :  { %873 = vmatpush1.bf16.msra.mxu1 %v2477_v29  ;;  %v2552_v21 = vld [vmem:[#allocation6 + $0x2dc] ss:$20 sps:$4 sm:$0x3f]   ;;  %v2555_v22 = vld [vmem:[#allocation6 + $0x2d8] ss:$20 sps:$4 sm:$0x3f]  }
  0x68   :  { %874 = vmatprep.subr.bf16.mxu1 %v2485_v32  ;;  %v2560_v24 = vld [vmem:[#allocation6 + $0x1c8] ss:$20 sps:$4 sm:$0xff]   ;;  %v776_v26 = vsel %vm768_vm0, %v2555_v22, 0  ;;  %v2557_v27 = vld [vmem:[#allocation6 + $0x2b0] ss:$20 sps:$4 sm:$0xff]   ;;  %vm2079_vm12 = vcmask 7168  }
  0x69   :  { %799 = vmatpush1.bf16.msra.mxu0 %v2486_v33  ;;  %v2559_v25 = vld [vmem:[#allocation6 + $0x2b4] ss:$20 sps:$4 sm:$0xff]   ;;  %v2564_v29 = vld [vmem:[#allocation6 + $0x28c] ss:$20 sps:$4 sm:$0xff]   ;;  %v2579_v49 = vld [vmem:[#allocation8 + $0x64] ss:$8 sps:$4 sm:$0xff]  }
  0x6a   :  { %800 = vmatprep.subr.bf16.mxu0 %v2487_v35  ;;  %v2561_v28 = vld [vmem:[#allocation6 + $0x88] ss:$20 sps:$4 sm:$0xff]   ;;  %v2565_v30 = vld [vmem:[#allocation6 + $0x1a0] ss:$20 sps:$4 sm:$0xff]   ;;  %v2567_v33 = vld [vmem:[#allocation6 + $0x178] ss:$20 sps:$4 sm:$0xff]  }
  0x6b   :  { %875 = vmatpush1.bf16.msra.mxu1 %v2483_v34  ;;  %v2562_v31 = vld [vmem:[#allocation6 + $0x288] ss:$20 sps:$4 sm:$0xff]   ;;  %v2566_v32 = vld [vmem:[#allocation6 + $0x60] ss:$20 sps:$4 sm:$0xff]   ;;  %v2568_v35 = vld [vmem:[#allocation6 + $0x38] ss:$20 sps:$4 sm:$0xff]  }
  0x6c   :  { %876 = vmatprep.subr.bf16.mxu1 %v2491_v36  ;;  %v2569_v34 = vld [vmem:[#allocation6 + $0x2e0] ss:$20 sps:$4 sm:$0x3f]   ;;  %v2570_v36 = vld [vmem:[#allocation6 + $0x150] ss:$20 sps:$4 sm:$0xff]  }
  0x6d   :  { %801 = vmatpush2.bf16.msra.mxu0 %v2492_v38  ;;  %v782_v38 = vsel %vm768_vm0, %v2569_v34, 0  ;;  %v2619_v22 = vld [vmem:[#allocation8 + $0xd0] ss:$8 sps:$4 sm:$0xff]   ;;  %v2637_v34 = vld [vmem:[#allocation8 + $0xa0] ss:$8 sps:$4 sm:$0xff]  }
  0x6e   :  { %802 = vmatprep.subr.bf16.mxu0 %v2493_v39  ;;  %v2571_v39 = vld [vmem:[#allocation6 + $0x10] ss:$20 sps:$4 sm:$0xff]  }
  0x6f   :  { %877 = vmatpush1.bf16.msra.mxu1 %v2489_v37  ;;  %v2869_v37 = vmov 0.0  }
  0x70   :  { %878 = vmatprep.subr.bf16.mxu1 %v2497_v40  ;;  %v2572_v40 = vld [vmem:[#allocation6 + $0x2b8] ss:$20 sps:$4 sm:$0xff]  }
  0x71   :  { %803 = vmatpush2.bf16.msra.mxu0 %v2498_v41  ;;  %v2594_v41 = vld [vmem:[#allocation8 + $0x174] ss:$8 sps:$4 sm:$0xff]  }
  0x72   :  { %804 = vmatprep.subr.bf16.mxu0 %v2499_v43  ;;  %v2573_v43 = vld [vmem:[#allocation6 + $0x290] ss:$20 sps:$4 sm:$0xff]  }
  0x73   :  { %879 = vmatpush1.bf16.msra.mxu1 %v2495_v42  ;;  %v2592_v42 = vld [vmem:[#allocation8 + $0x170] ss:$8 sps:$4 sm:$0xff]  }
  0x74   :  { %880 = vmatprep.subr.bf16.mxu1 %v2503_v44  ;;  %v2600_v44 = vld [vmem:[#allocation8 + $0x164] ss:$8 sps:$4 sm:$0xff]  }
  0x75   :  { %805 = vmatpush2.bf16.msra.mxu0 %v2504_v46  ;;  %v2598_v46 = vld [vmem:[#allocation8 + $0x160] ss:$8 sps:$4 sm:$0xff]  }
  0x76   :  { %806 = vmatprep.subr.bf16.mxu0 %v2505_v47  ;;  %v2574_v47 = vld [vmem:[#allocation8 + $0x70] ss:$8 sps:$4 sm:$0xff]  }
  0x77   :  { %881 = vmatpush1.bf16.msra.mxu1 %v2501_v45  ;;  %v2576_v45 = vld [vmem:[#allocation8 + $0x74] ss:$8 sps:$4 sm:$0xff]  }
  0x78   :  { %882 = vmatprep.subr.bf16.mxu1 %v2509_v48  ;;  %v2606_v48 = vld [vmem:[#allocation8 + $0x154] ss:$8 sps:$4 sm:$0xff]  }
  0x79   :  { %807 = vmatpush2.bf16.msra.mxu0 %v2510_v51  ;;  %v2577_v51 = vld [vmem:[#allocation8 + $0x60] ss:$8 sps:$4 sm:$0xff]  }
  0x7a   :  { %808 = vmatprep.subr.bf16.mxu0 %v2511_v53  ;;  %v2582_v53 = vld [vmem:[#allocation8 + $0x54] ss:$8 sps:$4 sm:$0xff]  }
  0x7b   :  { %883 = vmatpush2.bf16.msra.mxu1 %v2507_v50  ;;  %v2604_v50 = vld [vmem:[#allocation8 + $0x150] ss:$8 sps:$4 sm:$0xff]  }
  0x7c   :  { %884 = vmatprep.subr.bf16.mxu1 %v2515_v54  ;;  %v2610_v54 = vld [vmem:[#allocation8 + $0x140] ss:$8 sps:$4 sm:$0xff]  }
  0x7d   :  { %809 = vmatpush2.bf16.msra.mxu0 %v2516_v56  ;;  %v2618_v56 = vld [vmem:[#allocation8 + $0x134] ss:$8 sps:$4 sm:$0xff]  }
  0x7e   :  { %810 = vmatprep.subr.bf16.mxu0 %v2517_v57  ;;  %v2585_v57 = vld [vmem:[#allocation8 + $0x44] ss:$8 sps:$4 sm:$0xff]  }
  0x7f   :  { %885 = vmatpush2.bf16.msra.mxu1 %v2513_v55  ;;  %v2580_v55 = vld [vmem:[#allocation8 + $0x50] ss:$8 sps:$4 sm:$0xff]  }
  0x80   :  { %886 = vmatprep.subr.bf16.mxu1 %v2521_v58  ;;  %v2616_v58 = vld [vmem:[#allocation8 + $0x130] ss:$8 sps:$4 sm:$0xff]  }
  0x81   :  { %811 = vmatpush2.bf16.msra.mxu0 %v2522_v60  ;;  %v2624_v60 = vld [vmem:[#allocation8 + $0x124] ss:$8 sps:$4 sm:$0xff]  }
  0x82   :  { %812 = vmatprep.subr.bf16.mxu0 %v2523_v61  ;;  %v2588_v61 = vld [vmem:[#allocation8 + $0x34] ss:$8 sps:$4 sm:$0xff]  }
  0x83   :  { %887 = vmatpush2.bf16.msra.mxu1 %v2519_v59  ;;  %v2583_v59 = vld [vmem:[#allocation8 + $0x40] ss:$8 sps:$4 sm:$0xff]  }
  0x84   :  { %888 = vmatprep.subr.bf16.mxu1 %v2527_v62  ;;  %v2586_v62 = vld [vmem:[#allocation8 + $0x30] ss:$8 sps:$4 sm:$0xff]  }
  0x85   :  { %813 = vmatpush2.bf16.msra.mxu0 %v2528_v63  ;;  %v2630_v63 = vld [vmem:[#allocation8 + $0x114] ss:$8 sps:$4 sm:$0xff]  }
  0x86   :  { %814 = vmatprep.subr.bf16.mxu0 %v2529_v2  ;;  %v2628_v2 = vld [vmem:[#allocation8 + $0x110] ss:$8 sps:$4 sm:$0xff]  }
  0x87   :  { %889 = vmatpush2.bf16.msra.mxu1 %v2525_v1  ;;  %v2591_v1 = vld [vmem:[#allocation8 + $0x24] ss:$8 sps:$4 sm:$0xff]  }
  0x88   :  { %890 = vmatprep.subr.bf16.mxu1 %v2533_v3  ;;  %v2589_v3 = vld [vmem:[#allocation8 + $0x20] ss:$8 sps:$4 sm:$0xff]  }
  0x89   :  { %815 = vmatpush2.bf16.msra.mxu0 %v2534_v4  ;;  %v2636_v4 = vld [vmem:[#allocation8 + $0x104] ss:$8 sps:$4 sm:$0xff]  }
  0x8a   :  { %2307 = vmatprep.subr.bf16.mxu0 %v2540_v6  ;;  %v2634_v6 = vld [vmem:[#allocation8 + $0x100] ss:$8 sps:$4 sm:$0xff]  }
  0x8b   :  { %891 = vmatpush2.bf16.msra.mxu1 %v2531_v5  ;;  %v2597_v5 = vld [vmem:[#allocation8 + $0x14] ss:$8 sps:$4 sm:$0xff]  }
  0x8c   :  { %892 = vmatprep.subr.bf16.mxu1 %v2539_v7  ;;  %817 = vmatmul.mubr.bf16.vlgmr.msra.gmra.mxu0 %v2970_v8  ;;  %v2595_v7 = vld [vmem:[#allocation8 + $0x10] ss:$8 sps:$4 sm:$0xff]  }
  0x8d   :  { %2308 = vmatpush3.bf16.msra.mxu0 %v2541_v10  ;;  %980 = vmatprep.mubr.bf16.mxu0 %v2090_v52  ;;  %v2612_v52 = vld [vmem:[#allocation8 + $0x144] ss:$8 sps:$4 sm:$0xff]   ;;  %v2609_v10 = vld [vmem:[#allocation8 + $0xf4] ss:$8 sps:$4 sm:$0xff]  }
  0x8e   :  { %2309 = vmatprep.subr.bf16.mxu0 %v2545_v11  ;;  %v2607_v11 = vld [vmem:[#allocation8 + $0xf0] ss:$8 sps:$4 sm:$0xff]  }
  0x8f   :  { %893 = vmatpush2.bf16.msra.mxu1 %v2537_v9  ;;  %v2601_v9 = vld [vmem:[#allocation8] ss:$8 sps:$4 sm:$0xff]  }
  0x90   :  { %894 = vmatprep.subr.bf16.mxu1 %v2544_v12  ;;  %v2642_v12 = vld [vmem:[#allocation8 + $0x1f4] ss:$8 sps:$4 sm:$0xff]  }
  0x91   :  { %2310 = vmatpush3.bf16.msra.mxu0 %v2546_v14  ;;  %v2640_v14 = vld [vmem:[#allocation8 + $0x1f0] ss:$8 sps:$4 sm:$0xff]  }
  0x92   :  { %2311 = vmatprep.subr.bf16.mxu0 %v2550_v17  ;;  %v2648_v17 = vld [vmem:[#allocation8 + $0x1e4] ss:$8 sps:$4 sm:$0xff]  }
  0x93   :  { %895 = vmatpush2.bf16.msra.mxu1 %v2542_v13  ;;  %v2615_v13 = vld [vmem:[#allocation8 + $0xe4] ss:$8 sps:$4 sm:$0xff]  }
  0x94   :  { %896 = vmatprep.subr.bf16.mxu1 %v2549_v15  ;;  %v2613_v15 = vld [vmem:[#allocation8 + $0xe0] ss:$8 sps:$4 sm:$0xff]  }
  0x95   :  { %2312 = vmatpush3.bf16.msra.mxu0 %v2551_v18  ;;  %v2621_v18 = vld [vmem:[#allocation8 + $0xd4] ss:$8 sps:$4 sm:$0xff]  }
  0x96   :  { %2313 = vmatprep.subr.bf16.mxu0 %v2554_v20  ;;  %v2652_v20 = vld [vmem:[#allocation8 + $0x1d0] ss:$8 sps:$4 sm:$0xff]  }
  0x97   :  { %897 = vmatpush2.bf16.msra.mxu1 %v2547_v19  ;;  %v2646_v19 = vld [vmem:[#allocation8 + $0x1e0] ss:$8 sps:$4 sm:$0xff]  }
  0x98   :  { %2189 = vmatprep.subr.msk.bf16.mxu1 %vm768_vm0, %v2552_v21  ;;  %v2654_v21 = vld [vmem:[#allocation8 + $0x1d4] ss:$8 sps:$4 sm:$0xff]  }
  0x99   :  { %2314 = vmatpush3.bf16.msra.mxu0 %v2556_v23  ;;  %v2627_v23 = vld [vmem:[#allocation8 + $0xc4] ss:$8 sps:$4 sm:$0xff]  }
  0x9a   :  { %899 = vmatmul.mubr.bf16.vlgmr.msra.gmra.mxu1 %v2970_v8  ;;  %2315 = vmatprep.subr.bf16.mxu0 %v2560_v24  ;;  %v2625_v24 = vld [vmem:[#allocation8 + $0xc0] ss:$8 sps:$4 sm:$0xff]  }
  0x9b   :  { %918 = vmatpush1.bf16.msra.mxu1 %v776_v26  ;;  %939 = vmatprep.mubr.bf16.mxu1 %v2868_v0  ;;  %v2633_v26 = vld [vmem:[#allocation8 + $0xb4] ss:$8 sps:$4 sm:$0xff]  }
  0x9c   :  { %919 = vmatprep.subr.bf16.mxu1 %v2559_v25  ;;  %v2660_v25 = vld [vmem:[#allocation8 + $0x1c4] ss:$8 sps:$4 sm:$0xff]  }
  0x9d   :  { %2316 = vmatpush3.bf16.msra.mxu0 %v2561_v28  ;;  %v2631_v28 = vld [vmem:[#allocation8 + $0xb0] ss:$8 sps:$4 sm:$0xff]  }
  0x9e   :  { %2317 = vmatprep.subr.bf16.mxu0 %v2565_v30  ;;  %v2639_v30 = vld [vmem:[#allocation8 + $0xa4] ss:$8 sps:$4 sm:$0xff]  }
  0x9f   :  { %920 = vmatpush1.bf16.msra.mxu1 %v2557_v27  ;;  %v2658_v27 = vld [vmem:[#allocation8 + $0x1c0] ss:$8 sps:$4 sm:$0xff]  }
  0xa0   :  { %921 = vmatprep.subr.bf16.mxu1 %v2564_v29  ;;  %v2666_v29 = vld [vmem:[#allocation8 + $0x1b4] ss:$8 sps:$4 sm:$0xff]  }
  0xa1   :  { %2318 = vmatpush3.bf16.msra.mxu0 %v2566_v32  ;;  %v2672_v32 = vld [vmem:[#allocation8 + $0x1a4] ss:$8 sps:$4 sm:$0xff]  }
  0xa2   :  { %2319 = vmatprep.subr.bf16.mxu0 %v2567_v33  ;;  %v2670_v33 = vld [vmem:[#allocation8 + $0x1a0] ss:$8 sps:$4 sm:$0xff]  }
  0xa3   :  { %922 = vmatpush1.bf16.msra.mxu1 %v2562_v31  ;;  %v2664_v31 = vld [vmem:[#allocation8 + $0x1b0] ss:$8 sps:$4 sm:$0xff]  }
  0xa4   :  { %2373 = vmatprep.subr.bf16.mxu1 %v2869_v37 }
  0xa5   :  { %2320 = vmatpush3.bf16.msra.mxu0 %v2568_v35  ;;  %v2645_v35 = vld [vmem:[#allocation8 + $0x94] ss:$8 sps:$4 sm:$0xff]  }
  0xa6   :  { %2190 = vmatmul.mubr.msk.bf16.vlgmr.msra.gmra.mxu1 %vm764_vm1, %v2966_v16  ;;  %2321 = vmatprep.subr.bf16.mxu0 %v2570_v36  ;;  %v2643_v36 = vld [vmem:[#allocation8 + $0x90] ss:$8 sps:$4 sm:$0xff]  }
  0xa7   :  { %2374 = vmatpush3.bf16.msra.mxu1 %v782_v38  ;;  %2379 = vmatprep.mubr.msk.bf16.mxu1 %vm2870_vm2, %v2869_v37  ;;  %v2678_v38 = vld [vmem:[#allocation8 + $0x194] ss:$8 sps:$4 sm:$0xff]  }
  0xa8   :  { %2375 = vmatprep.subr.bf16.mxu1 %v2869_v37 }
  0xa9   :  { %2322 = vmatpush3.bf16.msra.mxu0 %v2571_v39  ;;  %v2651_v39 = vld [vmem:[#allocation8 + $0x84] ss:$8 sps:$4 sm:$0xff]  }
  0xaa   :  { %1582 = vmatprep.subr.bf16.mxu0 %v2594_v41  ;;  %v2649_v41 = vld [vmem:[#allocation8 + $0x80] ss:$8 sps:$4 sm:$0xff]  }
  0xab   :  { %2376 = vmatpush3.bf16.msra.mxu1 %v2572_v40  ;;  %v2676_v40 = vld [vmem:[#allocation8 + $0x190] ss:$8 sps:$4 sm:$0xff]  }
  0xac   :  { %2377 = vmatprep.subr.bf16.mxu1 %v2869_v37  ;;  %981 = vmatmul.mubr.bf16.vlgmr.msra.gmra.mxu0 %v2970_v8  ;;  %v2603_v8 = vld [vmem:[#allocation8 + $0x4] ss:$8 sps:$4 sm:$0xff]  }
  0xad   :  { %1583 = vmatpush1.bf16.msra.mxu0 %v2592_v42  ;;  %v2684_v42 = vld [vmem:[#allocation8 + $0x184] ss:$8 sps:$4 sm:$0xff]  }
  0xae   :  { %1584 = vmatprep.subr.bf16.mxu0 %v2600_v44  ;;  %v2682_v44 = vld [vmem:[#allocation8 + $0x180] ss:$8 sps:$4 sm:$0xff]  }
  0xaf   :  { %2378 = vmatpush3.bf16.msra.mxu1 %v2573_v43  ;;  %v2657_v43 = vld [vmem:[#allocation8 + $0x274] ss:$8 sps:$4 sm:$0xff]  }
  0xb0   :  { %1541 = vmatprep.subr.bf16.mxu1 %v2576_v45 }
  0xb1   :  { %1585 = vmatpush1.bf16.msra.mxu0 %v2598_v46 }
  0xb2   :  { %2380 = vmatmul.mubr.msk.bf16.vlgmr.msra.gmra.mxu1 %vm764_vm1, %v2966_v16  ;;  %1586 = vmatprep.subr.bf16.mxu0 %v2606_v48  ;;  %v2622_v16 = vld [vmem:[#allocation8 + $0x120] ss:$8 sps:$4 sm:$0xff]  }
  0xb3   :  { %1542 = vmatpush1.bf16.msra.mxu1 %v2574_v47 }
  0xb4   :  { %1543 = vmatprep.subr.bf16.mxu1 %v2579_v49  ;;  %v240_v49 = vlaneseq }
  0xb5   :  { %1587 = vmatpush1.bf16.msra.mxu0 %v2604_v50 }
  0xb6   :  { %1588 = vmatprep.subr.bf16.mxu0 %v2612_v52  ;;  %v2988_v50 = vshrl.u32 %v240_v49, 7  ;;  %v2994_v52 = vld [vmem:[%s3066_s3] sm:$0x1f] }
  0xb7   :  { %1544 = vmatpush1.bf16.msra.mxu1 %v2577_v51 }
  0xb8   :  { %1545 = vmatprep.subr.bf16.mxu1 %v2582_v53  ;;  %v242_v51 = vsub.s32 0, %v2988_v50  ;;  %v246_v53 = vsub.s32 1, %v2988_v50 }
  0xb9   :  { %1589 = vmatpush1.bf16.msra.mxu0 %v2610_v54 }
  0xba   :  { %1590 = vmatprep.subr.bf16.mxu0 %v2618_v56  ;;  %v243_v54 = vrot.slane %v2994_v52, %v242_v51 }
  0xbb   :  { %1546 = vmatpush1.bf16.msra.mxu1 %v2580_v55  ;;  %v247_v55 = vrot.slane %v2994_v52, %v246_v53 }
  0xbc   :  { %1547 = vmatprep.subr.bf16.mxu1 %v2585_v57 }
  0xbd   :  { %1591 = vmatpush1.bf16.msra.mxu0 %v2616_v58  ;;  %v3006_v58 = vstv %s3063_s0 }
  0xbe   :  { %1592 = vmatprep.subr.bf16.mxu0 %v2624_v60 }
  0xbf   :  { %1548 = vmatpush1.bf16.msra.mxu1 %v2583_v59 }
  0xc0   :  { %1549 = vmatprep.subr.bf16.mxu1 %v2588_v61 }
  0xc1   :  { %1593 = vmatpush1.bf16.msra.mxu0 %v2622_v16 }
  0xc2   :  { %1594 = vmatprep.subr.bf16.mxu0 %v2630_v63 }
  0xc3   :  { %1550 = vmatpush1.bf16.msra.mxu1 %v2586_v62 }
  0xc4   :  { %1551 = vmatprep.subr.bf16.mxu1 %v2591_v1 }
  0xc5   :  { %1595 = vmatpush1.bf16.msra.mxu0 %v2628_v2 }
  0xc6   :  { %1596 = vmatprep.subr.bf16.mxu0 %v2636_v4 }
  0xc7   :  { %1552 = vmatpush1.bf16.msra.mxu1 %v2589_v3 }
  0xc8   :  { %1553 = vmatprep.subr.bf16.mxu1 %v2597_v5 }
  0xc9   :  { %1597 = vmatpush1.bf16.msra.mxu0 %v2634_v6  ;;  %v2655_v6 = vld [vmem:[#allocation8 + $0x270] ss:$8 sps:$4 sm:$0xff]  }
  0xca   :  { %1598 = vmatprep.subr.bf16.mxu0 %v2642_v12  ;;  %v2669_v12 = vld [vmem:[#allocation8 + $0x254] ss:$8 sps:$4 sm:$0xff]  }
  0xcb   :  { %1554 = vmatpush1.bf16.msra.mxu1 %v2595_v7 }
  0xcc   :  { %1555 = vmatprep.subr.bf16.mxu1 %v2603_v8  ;;  %v2663_v8 = vld [vmem:[#allocation8 + $0x264] ss:$8 sps:$4 sm:$0xff]  }
  0xcd   :  { %1599 = vmatpush2.bf16.msra.mxu0 %v2640_v14 }
  0xce   :  { %1600 = vmatprep.subr.bf16.mxu0 %v2648_v17  ;;  %v2667_v17 = vld [vmem:[#allocation8 + $0x250] ss:$8 sps:$4 sm:$0xff]  }
  0xcf   :  { %1556 = vmatpush1.bf16.msra.mxu1 %v2601_v9 }
  0xd0   :  { %1557 = vmatprep.subr.bf16.mxu1 %v2609_v10  ;;  %v2661_v10 = vld [vmem:[#allocation8 + $0x260] ss:$8 sps:$4 sm:$0xff]  }
  0xd1   :  { %1601 = vmatpush2.bf16.msra.mxu0 %v2646_v19  ;;  %v2675_v19 = vld [vmem:[#allocation8 + $0x244] ss:$8 sps:$4 sm:$0xff]  }
  0xd2   :  { %1602 = vmatprep.subr.bf16.mxu0 %v2654_v21 }
  0xd3   :  { %1558 = vmatpush2.bf16.msra.mxu1 %v2607_v11 }
  0xd4   :  { %1559 = vmatprep.subr.bf16.mxu1 %v2615_v13  ;;  %v250_v13 = vsub.s32 2, %v2988_v50 }
  0xd5   :  { %1603 = vmatpush2.bf16.msra.mxu0 %v2652_v20 }
  0xd6   :  { %1604 = vmatprep.subr.bf16.mxu0 %v2660_v25  ;;  %v251_v20 = vrot.slane %v2994_v52, %v250_v13  ;;  %v2706_v13 = vld [vmem:[#allocation9 + $0x48] sm:$0xff]  }
  0xd7   :  { %1560 = vmatpush2.bf16.msra.mxu1 %v2613_v15  ;;  %v254_v15 = vsub.s32 3, %v2988_v50 }
  0xd8   :  { %1561 = vmatprep.subr.bf16.mxu1 %v2621_v18 }
  0xd9   :  { %1605 = vmatpush2.bf16.msra.mxu0 %v2658_v27  ;;  %v255_v21 = vrot.slane %v2994_v52, %v254_v15  ;;  %v2679_v27 = vld [vmem:[#allocation8 + $0x230] ss:$8 sps:$4 sm:$0xff]   ;;  %v2708_v15 = vld [vmem:[#allocation9 + $0x40] sm:$0xff]  }
  0xda   :  { %1606 = vmatprep.subr.bf16.mxu0 %v2666_v29  ;;  %v2687_v29 = vld [vmem:[#allocation8 + $0x224] ss:$8 sps:$4 sm:$0xff]  }
  0xdb   :  { %1562 = vmatpush2.bf16.msra.mxu1 %v2619_v22  ;;  %v2673_v22 = vld [vmem:[#allocation8 + $0x240] ss:$8 sps:$4 sm:$0xff]  }
  0xdc   :  { %1563 = vmatprep.subr.bf16.mxu1 %v2627_v23 }
  0xdd   :  { %1607 = vmatpush2.bf16.msra.mxu0 %v2664_v31 }
  0xde   :  { %1608 = vmatprep.subr.bf16.mxu0 %v2672_v32 }
  0xdf   :  { %1564 = vmatpush2.bf16.msra.mxu1 %v2625_v24 }
  0xe0   :  { %1565 = vmatprep.subr.bf16.mxu1 %v2633_v26 }
  0xe1   :  { %1609 = vmatpush2.bf16.msra.mxu0 %v2670_v33  ;;  %v258_v33 = vsub.s32 4, %v2988_v50 }
  0xe2   :  { %1610 = vmatprep.subr.bf16.mxu0 %v2678_v38 }
  0xe3   :  { %1566 = vmatpush2.bf16.msra.mxu1 %v2631_v28 }
  0xe4   :  { %1567 = vmatprep.subr.bf16.mxu1 %v2639_v30 }
  0xe5   :  { %1611 = vmatpush2.bf16.msra.mxu0 %v2676_v40 }
  0xe6   :  { %1612 = vmatprep.subr.bf16.mxu0 %v2684_v42 }
  0xe7   :  { %1568 = vmatpush2.bf16.msra.mxu1 %v2637_v34 }
  0xe8   :  { %1569 = vmatprep.subr.bf16.mxu1 %v2645_v35  ;;  %v2685_v35 = vld [vmem:[#allocation8 + $0x220] ss:$8 sps:$4 sm:$0xff]  }
  0xe9   :  { %1613 = vmatpush2.bf16.msra.mxu0 %v2682_v44 }
  0xeb   :  { %1570 = vmatpush2.bf16.msra.mxu1 %v2643_v36 }
  0xec   :  { %1571 = vmatprep.subr.bf16.mxu1 %v2651_v39  ;;  %v2690_v39 = vld [vmem:[#allocation8 + $0x214] ss:$8 sps:$4 sm:$0xff]  }
  0xef   :  { %1572 = vmatpush2.bf16.msra.mxu1 %v2649_v41 }
  0xf0   :  { %1623 = vmatprep.subr.bf16.mxu1 %v2657_v43  ;;  %v259_v43 = vrot.slane %v2994_v52, %v258_v33 }
 0x11a   :  { %v859_v45 = vpop.f32.mrf.mxu1 }
 0x11c   :  { %v861_v46 = vpop.f32.mrf.mxu1 }
 0x11e   :  { %v863_v47 = vpop.f32.mrf.mxu1 }
 0x120   :  { %v864_v48 = vpop.f32.mrf.mxu1 }
 0x121   :  { %v2693_v48 = vld [vmem:[#allocation8 + $0x204] ss:$8 sps:$4 sm:$0xff]  }
 0x14c   :  { %v818_v56 = vpop.f32.mrf.mxu0 }
 0x14d   :  { %v819_v57 = vadd.f32 %v818_v56, %v243_v54 }
 0x14e   :  { %v820_v59 = vpop.f32.mrf.mxu0 }
 0x14f   :  { %v860_v60 = vadd.f32 %v859_v45, %v819_v57  ;;  %v821_v61 = vadd.f32 %v820_v59, %v247_v55  ;;  %v2691_v57 = vld [vmem:[#allocation8 + $0x200] ss:$8 sps:$4 sm:$0xff]  }
 0x150   :  { %v822_v16 = vpop.f32.mrf.mxu0 }
 0x151   :  { %vm1028_vm3 = vcmp.gt.f32.partialorder %v860_v60, 0.0  ;;  %v1034_v62 = vmul.f32 %v3006_v58, %v860_v60  ;;  %v862_v63 = vadd.f32 %v861_v46, %v821_v61  ;;  %v2688_v46 = vld [vmem:[#allocation8 + $0x210] ss:$8 sps:$4 sm:$0xff]  }
 0x152   :  { %v823_v1 = vpop.f32.mrf.mxu0 }
 0x153   :  { %v1035_v2 = vmul.f32 %v3006_v58, %v862_v63  ;;  %vm1029_vm4 = vcmp.gt.f32.partialorder %v862_v63, 0.0  ;;  %v1039_v3 = vsel %vm1028_vm3, %v860_v60, %v1034_v62  ;;  %v2694_v1 = vld [vmem:[#allocation9 + $0x78] sm:$0xff]  }
 0x154   :  { %v1044_v7 = vpack.c.bf16 %v1039_v3, %v1039_v3  ;;  %v2696_v3 = vld [vmem:[#allocation9 + $0x70] sm:$0xff]   ;;  %2333 = vmatprep.subr.bf16.mxu0 %v2694_v1 }
 0x155   :  { %v1040_v4 = vsel %vm1029_vm4, %v862_v63, %v1035_v2  ;;  %v2695_v2 = vld [vmem:[#allocation9 + $0x38] sm:$0xff]  }
 0x156   :  { %v1045_v5 = vpack.c.bf16 %v1040_v4, %v1040_v4  ;;  %v2697_v4 = vld [vmem:[#allocation9 + $0x30] sm:$0xff]  }
 0x158   :  { %1573 = vmatprep.mubr.bf16.mxu1 %v1045_v5  ;;  %v2698_v5 = vld [vmem:[#allocation9 + $0x68] sm:$0xff]  }
 0x159   :  { %1574 = vmatmul.mubr.bf16.vlgmr.msra.gmra.mxu1 %v1044_v7  ;;  %v2700_v7 = vld [vmem:[#allocation9 + $0x60] sm:$0xff]  }
 0x15a   :  { %v900_v9 = vpop.f32.mrf.mxu1  ;;  %1624 = vmatpush1.bf16.msra.mxu1 %v2655_v6  ;;  %1655 = vmatprep.mubr.bf16.mxu1 %v2868_v0  ;;  %v2681_v0 = vld [vmem:[#allocation8 + $0x234] ss:$8 sps:$4 sm:$0xff]   ;;  %v2699_v6 = vld [vmem:[#allocation9 + $0x28] sm:$0xff]  }
 0x15b   :  { %1625 = vmatprep.subr.bf16.mxu1 %v2663_v8  ;;  %v901_v23 = vadd.f32 %v900_v9, %v251_v20  ;;  %v2701_v8 = vld [vmem:[#allocation9 + $0x20] sm:$0xff]   ;;  %v2702_v9 = vld [vmem:[#allocation9 + $0x58] sm:$0xff]   ;;  %v2712_v20 = vld [vmem:[#allocation11 + $0x28] sm:$0xff]  }
 0x15c   :  { %v902_v11 = vpop.f32.mrf.mxu1 }
 0x15d   :  { %v903_v25 = vadd.f32 %v902_v11, %v255_v21  ;;  %v2704_v11 = vld [vmem:[#allocation9 + $0x50] sm:$0xff]   ;;  %v2713_v21 = vld [vmem:[#allocation11 + $0x20] sm:$0xff]  }
 0x15e   :  { %v904_v14 = vpop.f32.mrf.mxu1  ;;  %1626 = vmatpush1.bf16.msra.mxu1 %v2661_v10  ;;  %v2703_v10 = vld [vmem:[#allocation9 + $0x18] sm:$0xff]  }
 0x15f   :  { %1627 = vmatprep.subr.bf16.mxu1 %v2669_v12  ;;  %v2705_v12 = vld [vmem:[#allocation9 + $0x10] sm:$0xff]   ;;  %v2707_v14 = vld [vmem:[#allocation9 + $0x8] sm:$0xff]  }
 0x160   :  { %v905_v18 = vpop.f32.mrf.mxu1 }
 0x161   :  { %v2710_v18 = vld [vmem:[#allocation11 + $0x38] sm:$0xff]  }
 0x162   :  { %1628 = vmatpush1.bf16.msra.mxu1 %v2667_v17  ;;  %v2709_v17 = vld [vmem:[#allocation9] sm:$0xff]  }
 0x163   :  { %1629 = vmatprep.subr.bf16.mxu1 %v2675_v19  ;;  %v2711_v19 = vld [vmem:[#allocation11 + $0x30] sm:$0xff]  }
 0x166   :  { %v941_v24 = vpop.f32.mrf.mxu1  ;;  %1630 = vmatpush1.bf16.msra.mxu1 %v2673_v22  ;;  %v2714_v22 = vld [vmem:[#allocation11 + $0x18] sm:$0xff]  }
 0x167   :  { %v942_v26 = vadd.f32 %v941_v24, %v901_v23  ;;  %1631 = vmatprep.subr.bf16.mxu1 %v2681_v0 }
 0x168   :  { %v943_v28 = vpop.f32.mrf.mxu1 }
 0x169   :  { %vm1030_vm5 = vcmp.gt.f32.partialorder %v942_v26, 0.0  ;;  %v1036_v30 = vmul.f32 %v3006_v58, %v942_v26  ;;  %v944_v31 = vadd.f32 %v943_v28, %v903_v25 }
 0x16a   :  { %v945_v32 = vpop.f32.mrf.mxu1  ;;  %1632 = vmatpush1.bf16.msra.mxu1 %v2679_v27 }
 0x16b   :  { %vm1031_vm6 = vcmp.gt.f32.partialorder %v944_v31, 0.0  ;;  %v1037_v34 = vmul.f32 %v3006_v58, %v944_v31  ;;  %v1041_v36 = vsel %vm1030_vm5, %v942_v26, %v1036_v30  ;;  %1633 = vmatprep.subr.bf16.mxu1 %v2687_v29  ;;  %v1129_v26 = vld [vmem:[%s3068_s5] sm:$0x3] }
 0x16c   :  { %v946_v38 = vpop.f32.mrf.mxu1  ;;  %v2323_v40 = vpop.f32.mrf.mxu0  ;;  %v1046_v44 = vpack.c.bf16 %v1041_v36, %v1041_v36  ;;  %v1134_v29 = vrot.slane %v1129_v26, %v242_v51 }
 0x16d   :  { %v1042_v41 = vsel %vm1031_vm6, %v944_v31, %v1037_v34  ;;  %v1138_v31 = vrot.slane %v1129_v26, %v246_v53 }
 0x16e   :  { %v1047_v42 = vpack.c.bf16 %v1042_v41, %v1042_v41  ;;  %v2324_v45 = vpop.f32.mrf.mxu0  ;;  %1634 = vmatpush1.bf16.msra.mxu1 %v2685_v35 }
 0x16f   :  { %v2325_v47 = vadd.f32 %v2324_v45, %v2323_v40  ;;  %1635 = vmatprep.subr.bf16.mxu1 %v2690_v39 }
 0x170   :  { %1614 = vmatprep.mubr.bf16.mxu0 %v1047_v42  ;;  %v2326_v49 = vpop.f32.mrf.mxu0 }
 0x171   :  { %1615 = vmatmul.mubr.bf16.vlgmr.msra.gmra.mxu0 %v1046_v44  ;;  %v983_v54 = vadd.f32 %v2325_v47, %v259_v43  ;;  %v2715_v47 = vld [vmem:[#allocation11 + $0x10] sm:$0xff]   ;;  %v2717_v49 = vld [vmem:[#allocation11] sm:$0xff]  }
 0x172   :  { %v1022_v55 = vpop.f32.mrf.mxu1  ;;  %v2327_v56 = vpop.f32.mrf.mxu0  ;;  %1636 = vmatpush1.bf16.msra.mxu1 %v2688_v46  ;;  %2334 = vmatpush3.bf16.msra.mxu0 %v2695_v2 }
 0x173   :  { %v1023_v59 = vadd.f32 %v1022_v55, %v983_v54  ;;  %1637 = vmatprep.subr.bf16.mxu1 %v2693_v48  ;;  %2335 = vmatprep.subr.bf16.mxu0 %v2696_v3  ;;  %v2716_v48 = vld [vmem:[#allocation11 + $0x8] sm:$0xff]   ;;  %v2718_v54 = vld [vmem:[#allocation12 + $0x38] sm:$0xff]   ;;  %v2719_v55 = vld [vmem:[#allocation12 + $0x30] sm:$0xff]  }
 0x174   :  { %v2381_v60 = vpop.f32.mrf.mxu1  ;;  %v2720_v56 = vld [vmem:[#allocation12 + $0x28] sm:$0xff]  }
 0x175   :  { %vm1032_vm7 = vcmp.gt.f32.partialorder %v1023_v59, 0.0  ;;  %v1038_v52 = vmul.f32 %v3006_v58, %v1023_v59  ;;  %v2723_v60 = vld [vmem:[#allocation12 + $0x10] sm:$0xff]  }
 0x176   :  { %v1025_v61 = vpop.f32.mrf.mxu1  ;;  %1638 = vmatpush1.bf16.msra.mxu1 %v2691_v57  ;;  %2336 = vmatpush3.bf16.msra.mxu0 %v2697_v4  ;;  %v2721_v57 = vld [vmem:[#allocation12 + $0x20] sm:$0xff]  }
 0x177   :  { %v1043_v16 = vsel %vm1032_vm7, %v1023_v59, %v1038_v52  ;;  %2383 = vmatprep.subr.bf16.mxu1 %v2869_v37  ;;  %2337 = vmatprep.subr.bf16.mxu0 %v2698_v5  ;;  %v2722_v59 = vld [vmem:[#allocation12 + $0x18] sm:$0xff]  }
 0x178   :  { %v2382_v62 = vpop.f32.mrf.mxu1  ;;  %v1048_v63 = vpack.c.bf16 %v1043_v16, %v1043_v16  ;;  %v2272_v61 = vld [vmem:[%s3070_s7] ss:$0 sm:$0xff] }
 0x17a   :  { %1656 = vmatmul.mubr.bf16.vlgmr.msra.gmra.mxu1 %v1048_v63  ;;  %2338 = vmatpush3.bf16.msra.mxu0 %v2699_v6  ;;  %v2724_v6 = vld [vmem:[#allocation12 + $0x8] sm:$0xff]  }
 0x17b   :  { %2399 = vmatprep.mubr.msk.bf16.mxu1 %vm2870_vm2, %v2869_v37  ;;  %2339 = vmatprep.subr.bf16.mxu0 %v2700_v7  ;;  %v2725_v7 = vld [vmem:[#allocation12] sm:$0xff]  }
 0x17c   :  { %2384 = vmatpush3.bf16.msra.mxu1 %v2710_v18 }
 0x17d   :  { %2385 = vmatprep.subr.bf16.mxu1 %v2869_v37 }
 0x17e   :  { %2340 = vmatpush3.bf16.msra.mxu0 %v2701_v8  ;;  %v2289_v8 = vld [vmem:[%s3072_s9] ss:$0 sm:$0xff] }
 0x17f   :  { %2341 = vmatprep.subr.bf16.mxu0 %v2702_v9 }
 0x180   :  { %2386 = vmatpush3.bf16.msra.mxu1 %v2711_v19 }
 0x181   :  { %2387 = vmatprep.subr.bf16.mxu1 %v2869_v37 }
 0x182   :  { %2342 = vmatpush3.bf16.msra.mxu0 %v2703_v10 }
 0x183   :  { %2343 = vmatprep.subr.bf16.mxu0 %v2704_v11 }
 0x184   :  { %2388 = vmatpush3.bf16.msra.mxu1 %v2712_v20 }
 0x185   :  { %2389 = vmatprep.subr.bf16.mxu1 %v2869_v37 }
 0x186   :  { %2344 = vmatpush3.bf16.msra.mxu0 %v2705_v12 }
 0x187   :  { %2345 = vmatprep.subr.bf16.mxu0 %v2706_v13 }
 0x188   :  { %2390 = vmatpush3.bf16.msra.mxu1 %v2713_v21 }
 0x189   :  { %2391 = vmatprep.subr.bf16.mxu1 %v2869_v37 }
 0x18a   :  { %2346 = vmatpush3.bf16.msra.mxu0 %v2707_v14 }
 0x18b   :  { %2347 = vmatprep.subr.bf16.mxu0 %v2708_v15 }
 0x18c   :  { %2392 = vmatpush3.bf16.msra.mxu1 %v2714_v22 }
 0x18d   :  { %2393 = vmatprep.subr.bf16.mxu1 %v2869_v37 }
 0x18e   :  { %2348 = vmatpush3.bf16.msra.mxu0 %v2709_v17 }
 0x18f   :  { %2403 = vmatprep.subr.bf16.mxu0 %v2869_v37 }
 0x190   :  { %2394 = vmatpush3.bf16.msra.mxu1 %v2715_v47 }
 0x191   :  { %2395 = vmatprep.subr.bf16.mxu1 %v2869_v37 }
 0x194   :  { %2396 = vmatpush3.bf16.msra.mxu1 %v2716_v48 }
 0x195   :  { %2397 = vmatprep.subr.bf16.mxu1 %v2869_v37 }
 0x198   :  { %2398 = vmatpush3.bf16.msra.mxu1 %v2717_v49 }
 0x219   :  { %v1575_v0 = vpop.f32.mrf.mxu1 }
 0x21a   :  { %v1576_v33 = vadd.f32 %v1575_v0, %v1134_v29 }
 0x21b   :  { %v1577_v23 = vpop.f32.mrf.mxu1 }
 0x21c   :  { %v1578_v34 = vadd.f32 %v1577_v23, %v1138_v31 }
 0x21d   :  { %v1579_v24 = vpop.f32.mrf.mxu1 }
 0x21f   :  { %v1580_v25 = vpop.f32.mrf.mxu1 }
 0x231   :  { %v1616_v27 = vpop.f32.mrf.mxu0 }
 0x232   :  { %v1617_v35 = vadd.f32 %v1616_v27, %v1576_v33 }
 0x233   :  { %v1618_v28 = vpop.f32.mrf.mxu0 }
 0x234   :  { %v1619_v38 = vadd.f32 %v1618_v28, %v1578_v34 }
 0x235   :  { %v1620_v30 = vpop.f32.mrf.mxu0 }
 0x237   :  { %v1621_v32 = vpop.f32.mrf.mxu0 }
 0x23a   :  { %v1657_v36 = vpop.f32.mrf.mxu1 }
 0x23b   :  { %v1658_v39 = vadd.f32 %v1657_v36, %v1617_v35 }
 0x23c   :  { %v1659_v40 = vpop.f32.mrf.mxu1 }
 0x23d   :  { %vm1664_vm8 = vcmp.gt.f32.partialorder %v1658_v39, 0.0  ;;  %v1666_v41 = vmul.f32 %v1658_v39, %v3006_v58  ;;  %v1660_v42 = vadd.f32 %v1659_v40, %v1619_v38 }
 0x23e   :  { %v1661_v43 = vpop.f32.mrf.mxu1 }
 0x23f   :  { %vm1665_vm9 = vcmp.gt.f32.partialorder %v1660_v42, 0.0  ;;  %v1667_v51 = vmul.f32 %v1660_v42, %v3006_v58  ;;  %v1668_v44 = vsel %vm1664_vm8, %v1658_v39, %v1666_v41 }
 0x240   :  { %v1662_v45 = vpop.f32.mrf.mxu1  ;;  %v1670_v46 = vpack.c.bf16 %v1668_v44, %v1668_v44 }
 0x241   :  { %v1669_v50 = vsel %vm1665_vm9, %v1660_v42, %v1667_v51 }
 0x242   :  { %v1671_v53 = vpack.c.bf16 %v1669_v50, %v1669_v50 }
 0x244   :  { %1839 = vmatprep.mubr.bf16.mxu0 %v1671_v53 }
 0x245   :  { %1840 = vmatmul.mubr.bf16.vlgmr.msra.gmra.mxu0 %v1670_v46 }
 0x246   :  { %2419 = vmatprep.mubr.msk.bf16.mxu0 %vm2870_vm2, %v2869_v37  ;;  %2404 = vmatpush3.bf16.msra.mxu0 %v2718_v54 }
 0x247   :  { %2405 = vmatprep.subr.bf16.mxu0 %v2869_v37 }
 0x24a   :  { %2406 = vmatpush3.bf16.msra.mxu0 %v2719_v55 }
 0x24b   :  { %2407 = vmatprep.subr.bf16.mxu0 %v2869_v37 }
 0x24e   :  { %2408 = vmatpush3.bf16.msra.mxu0 %v2720_v56 }
 0x24f   :  { %2409 = vmatprep.subr.bf16.mxu0 %v2869_v37 }
 0x252   :  { %2410 = vmatpush3.bf16.msra.mxu0 %v2721_v57 }
 0x253   :  { %2411 = vmatprep.subr.bf16.mxu0 %v2869_v37 }
 0x256   :  { %2412 = vmatpush3.bf16.msra.mxu0 %v2722_v59 }
 0x257   :  { %2413 = vmatprep.subr.bf16.mxu0 %v2869_v37 }
 0x25a   :  { %2414 = vmatpush3.bf16.msra.mxu0 %v2723_v60 }
 0x25b   :  { %2415 = vmatprep.subr.bf16.mxu0 %v2869_v37 }
 0x25e   :  { %2416 = vmatpush3.bf16.msra.mxu0 %v2724_v6 }
 0x25f   :  { %2417 = vmatprep.subr.bf16.mxu0 %v2869_v37  ;;  %v2298_v37 = vld [vmem:[%s3074_s11] ss:$0 sm:$0xff] }
 0x262   :  { %2418 = vmatpush3.bf16.msra.mxu0 %v2725_v7 }
 0x305   :  { %v2349_v52 = vpop.f32.mrf.mxu0 }
 0x307   :  { %v2350_v16 = vpop.f32.mrf.mxu0 }
 0x308   :  { %v2351_v62 = vadd.f32 %v2350_v16, %v2349_v52 }
 0x309   :  { %v2352_v63 = vpop.f32.mrf.mxu0 }
 0x30a   :  { %v1842_v1 = vadd.f32 %v2351_v62, %v2272_v61 }
 0x30b   :  { %v2353_v2 = vpop.f32.mrf.mxu0 }
 0x30c   :  { %vm1847_vm10 = vcmp.gt.f32.partialorder %v1842_v1, 0.0  ;;  %v1848_v3 = vmul.f32 %v1842_v1, %v3006_v58 }
 0x30e   :  { %v1849_v4 = vsel %vm1847_vm10, %v1842_v1, %v1848_v3 }
 0x30f   :  { %v1850_v5 = vpack.c.bf16 %v1849_v4, %v1849_v4 }
 0x311   :  { %2400 = vmatmul.mubr.bf16.vlgmr.msra.gmra.mxu1 %v1850_v5 }
 0x3d1   :  { %v1956_v9 = vpop.f32.mrf.mxu1 }
 0x3d2   :  { %v1957_v10 = vadd.f32 %v2289_v8, %v1956_v9 }
 0x3d3   :  { %v2401_v11 = vpop.f32.mrf.mxu1 }
 0x3d4   :  { %vm1962_vm11 = vcmp.gt.f32.partialorder %v1957_v10, 0.0  ;;  %v1963_v12 = vmul.f32 %v1957_v10, %v3006_v58 }
 0x3d5   :  { %v1959_v13 = vpop.f32.mrf.mxu1 }
 0x3d6   :  { %v1964_v14 = vsel %vm1962_vm11, %v1957_v10, %v1963_v12 }
 0x3d7   :  { %v1965_v15 = vpack.c.bf16 %v1964_v14, %v1964_v14  ;;  %v2402_v17 = vpop.f32.mrf.mxu1 }
 0x3d9   :  { %2420 = vmatmul.mubr.bf16.vlgmr.msra.gmra.mxu0 %v1965_v15 }
 0x499   :  { %v2071_v18 = vpop.f32.mrf.mxu0 }
 0x49a   :  { %v2072_v19 = vadd.f32 %v2298_v37, %v2071_v18 }
 0x49b   :  { %v2421_v20 = vpop.f32.mrf.mxu0 }
 0x49c   :  { %2726 = vtanh.f32 %v2072_v19 }
 0x49d   :  { %v2074_v21 = vpop.f32.mrf.mxu0 }
 0x49f   :  { %v2422_v22 = vpop.f32.mrf.mxu0 }
 0x4a9   :  { %v2727_v0 = vpop.eup %2726 }
 0x4aa   :  { %v2078_v23 = vmul.f32 100.0, %v2727_v0 }
 0x4ac   :  { %2080 = vst.msk [vmem:[%s3075_s12] sm:$0xff] %vm2079_vm12, %v2078_v23 }
 0x4ad   :  { %2085 = vsyncpa [#allocation5], 1 }
 0x4ae   :  { %2086 = vsyncpa [#allocation7], 1 }
 0x4af   :  { %2087 = vsyncpa [#allocation10], 1 }
 0x4b0   :  { %2088 = vsyncpa [#allocation13], 1 }

</bundles_post_ra>
